<compile_context>
chip_gen: v6e
topology: v6e:2x2x1
jax: 0.10.0
libtpu: 0.0.40
codegen_flags: <defaults>
</compile_context>

<pallas_src>
import math
import functools

import jax
import jax.numpy as jnp
from jax.experimental import pallas as pl
from jax.experimental.pallas import tpu as pltpu


def _ffn_kernel(x_ref, w1_ref, b1_ref, w2_ref, b2_ref, o_ref, xn_ref, acc_ref):
    # grid = (row_tiles, f_tiles); k is the reduction axis over dim_ff.
    k = pl.program_id(1)

    @pl.when(k == 0)
    def _():
        # --- LayerNorm (eps=1e-6, biased variance, affine folded into w1/b1) ---
        x = x_ref[...].astype(jnp.float32)
        mean = jnp.mean(x, axis=-1, keepdims=True)
        centered = x - mean
        var = jnp.mean(centered * centered, axis=-1, keepdims=True)
        xn = centered * jax.lax.rsqrt(var + 1e-6)
        xn_ref[...] = xn.astype(xn_ref.dtype)          # stored in MXU input dtype
        acc_ref[...] = jnp.zeros_like(acc_ref)

    # --- w_1 slice: (tm, D) @ (D, tf) -> (tm, tf), f32 accumulate on MXU ---
    h = jnp.dot(xn_ref[...], w1_ref[...], preferred_element_type=jnp.float32)
    h = h + b1_ref[...]                                # b1 already folded with beta, f32

    # --- tanh-approx GELU (matches reference `gelu` exactly), f32 on VPU/EUP ---
    c = math.sqrt(2.0 / math.pi)
    g = 0.5 * h * (1.0 + jnp.tanh(c * (h + 0.044715 * (h * h * h))))

    # dropout_1: identity (eval mode)

    # --- w_2 partial: (tm, tf) @ (tf, D) -> accumulate into (tm, D) f32 ---
    acc_ref[...] += jnp.dot(g.astype(w2_ref.dtype), w2_ref[...],
                            preferred_element_type=jnp.float32)

    # dropout_2: identity (eval mode)

    @pl.when(k == pl.num_programs(1) - 1)
    def _():
        y = acc_ref[...] + b2_ref[...].astype(jnp.float32) + x_ref[...].astype(jnp.float32)
        o_ref[...] = y.astype(o_ref.dtype)


@functools.partial(jax.jit, static_argnames=("tm", "tf"))
def pos_feed_forward(x, w1, b1, w2, b2, gamma, beta, *, tm=256, tf=512):
    """x: (B, S, D). w1: (D, F), b1: (F,), w2: (F, D), b2: (D,), gamma/beta: (D,)."""
    B, S, D = x.shape
    F = w1.shape[1]
    rows = B * S
    x2 = x.reshape(rows, D)

    # Fold LayerNorm affine into the first linear: (xn*g + b) @ W1 + b1
    #   == xn @ (g[:,None]*W1) + (b1 + b @ W1)   (exact algebra)
    w1f = (w1.astype(jnp.float32) * gamma.astype(jnp.float32)[:, None]).astype(w1.dtype)
    b1f = (b1.astype(jnp.float32)
           + beta.astype(jnp.float32) @ w1.astype(jnp.float32)).reshape(1, F)
    b2_2 = b2.reshape(1, D)

    # Row tile: big (MXU-friendly), multiple of 8, clamped for tiny inputs.
    tm_eff = min(tm, ((rows + 7) // 8) * 8)
    # dim_ff tile: multiple of 128 that divides F exactly (else keep F resident) so
    # no padded reduction garbage enters the accumulator.
    if F <= tf or F % tf != 0 or tf % 128 != 0:
        tf_eff = F
    else:
        tf_eff = tf

    grid = (pl.cdiv(rows, tm_eff), F // tf_eff)

    x_it = jnp.dtype(x.dtype).itemsize
    w_it = jnp.dtype(w1.dtype).itemsize
    # Double-buffered io + weight slices, scratch, and h/gelu intermediates, with headroom.
    vmem_est = (2 * tm_eff * D * (x_it + x_it)                # x tile + out tile
                + 2 * (D * tf_eff + tf_eff * D) * w_it        # w1/w2 slices
                + 2 * (tf_eff * 4 + D * w_it)                 # biases
                + tm_eff * D * (w_it + 4)                     # xn + acc scratch
                + 2 * tm_eff * tf_eff * 4)                    # h / gelu temporaries
    vmem_limit = int(min(max(2 * vmem_est, 32 * 1024 * 1024), 64 * 1024 * 1024))

    cost = pl.CostEstimate(
        flops=4 * rows * D * F,                               # two matmuls @ 2*M*N*K
        transcendentals=rows * F,                             # tanh in GELU
        bytes_accessed=2 * rows * D * x_it + (D * F + F * D + F + D) * w_it,
    )

    out2 = pl.pallas_call(
        _ffn_kernel,
        out_shape=jax.ShapeDtypeStruct((rows, D), x.dtype),
        grid_spec=pltpu.PrefetchScalarGridSpec(
            num_scalar_prefetch=0,
            grid=grid,
            in_specs=[
                pl.BlockSpec((tm_eff, D), lambda i, k: (i, 0)),    # x rows (resident over k)
                pl.BlockSpec((D, tf_eff), lambda i, k: (0, k)),    # w1 slice (affine folded)
                pl.BlockSpec((1, tf_eff), lambda i, k: (0, k)),    # b1 slice (f32, beta folded)
                pl.BlockSpec((tf_eff, D), lambda i, k: (k, 0)),    # w2 slice
                pl.BlockSpec((1, D), lambda i, k: (0, 0)),         # b2
            ],
            out_specs=pl.BlockSpec((tm_eff, D), lambda i, k: (i, 0)),
            scratch_shapes=[
                pltpu.VMEM((tm_eff, D), w1.dtype),                 # normalized x, MXU dtype
                pltpu.VMEM((tm_eff, D), jnp.float32),              # output accumulator
            ],
        ),
        compiler_params=pltpu.CompilerParams(
            dimension_semantics=("parallel", "arbitrary"),
            vmem_limit_bytes=vmem_limit,
        ),
        cost_estimate=cost,
    )(x2, w1f, b1f, w2, b2_2)

    return out2.reshape(B, S, D)


def _reference(x, w1, b1, w2, b2, gamma, beta):
    xf = x.astype(jnp.float32)
    mean = jnp.mean(xf, -1, keepdims=True)
    var = jnp.mean((xf - mean) ** 2, -1, keepdims=True)
    xn = (xf - mean) / jnp.sqrt(var + 1e-6) * gamma + beta
    h = xn @ w1 + b1
    c = math.sqrt(2.0 / math.pi)
    h = 0.5 * h * (1.0 + jnp.tanh(c * (h + 0.044715 * h ** 3)))
    y = h @ w2 + b2
    return (y + xf).astype(x.dtype)


if __name__ == "__main__":
    # Small shapes consistent with the module; D is a multiple of 128 so the
    # output slab is lane-dense (no masked partial stores).
    B, S, D, Fh = 2, 8, 128, 256
    key = jax.random.PRNGKey(0)
    kx, kw1, kb1, kw2, kb2, kg, kbe = jax.random.split(key, 7)

    x = jax.random.normal(kx, (B, S, D), dtype=jnp.float32)

    # PyTorch-Linear-style fan-in uniform init
    bound1 = 1.0 / math.sqrt(D)
    w1 = jax.random.uniform(kw1, (D, Fh), jnp.float32, -bound1, bound1)
    b1 = jax.random.uniform(kb1, (Fh,), jnp.float32, -bound1, bound1)
    bound2 = 1.0 / math.sqrt(Fh)
    w2 = jax.random.uniform(kw2, (Fh, D), jnp.float32, -bound2, bound2)
    b2 = jax.random.uniform(kb2, (D,), jnp.float32, -bound2, bound2)
    # Non-trivial affine to exercise the gamma/beta folding
    gamma = 1.0 + 0.1 * jax.random.normal(kg, (D,), jnp.float32)
    beta = 0.1 * jax.random.normal(kbe, (D,), jnp.float32)

    out = pos_feed_forward(x, w1, b1, w2, b2, gamma, beta)
    jax.block_until_ready(out)

    ref = _reference(x, w1, b1, w2, b2, gamma, beta)
    assert out.shape == (B, S, D)
    assert jnp.allclose(out, ref, atol=1e-3, rtol=1e-3), float(jnp.max(jnp.abs(out - ref)))

    print("KERNEL_OK")
</pallas_src>

<mosaic_0001>
module attributes {stable_mosaic.version = 11 : i64} {
  func.func @_ffn_kernel(%arg0: i32, %arg1: i32, %arg2: memref<16x128xf32, #tpu.memory_space<vmem>>, %arg3: memref<128x256xf32, #tpu.memory_space<vmem>>, %arg4: memref<1x256xf32, #tpu.memory_space<vmem>>, %arg5: memref<256x128xf32, #tpu.memory_space<vmem>>, %arg6: memref<1x128xf32, #tpu.memory_space<vmem>>, %arg7: memref<16x128xf32, #tpu.memory_space<vmem>>, %arg8: memref<16x128xf32, #tpu.memory_space<vmem>>, %arg9: memref<16x128xf32, #tpu.memory_space<vmem>>) attributes {dimension_semantics = [#tpu.dimension_semantics<parallel>, #tpu.dimension_semantics<arbitrary>], iteration_bounds = array<i64: 1, 1>, scalar_prefetch = 0 : i64, scratch_operands = 2 : i64, tpu.core_type = #tpu.core_type<tc>, window_params = [{transform_indices = @transform_0, window_bounds = array<i64: 16, 128>}, {transform_indices = @transform_1, window_bounds = array<i64: 128, 256>}, {transform_indices = @transform_2, window_bounds = array<i64: 1, 256>}, {transform_indices = @transform_3, window_bounds = array<i64: 256, 128>}, {pipeline_mode = #tpu.pipeline_mode<synchronous>, transform_indices = @transform_4, window_bounds = array<i64: 1, 128>}, {transform_indices = @transform_5, window_bounds = array<i64: 16, 128>}]} {
    %c0_i32 = arith.constant 0 : i32
    %0 = arith.cmpi eq, %arg1, %c0_i32 : i32
    %1 = arith.extui %0 : i1 to i32
    %c0_i32_0 = arith.constant 0 : i32
    %2 = arith.cmpi ne, %1, %c0_i32_0 : i32
    scf.if %2 {
      %c0_19 = arith.constant 0 : index
      %c0_20 = arith.constant 0 : index
      %30 = vector.load %arg2[%c0_19, %c0_20] : memref<16x128xf32, #tpu.memory_space<vmem>>, vector<16x128xf32>
      %cst_21 = arith.constant dense<0.000000e+00> : vector<16xf32>
      %31 = vector.multi_reduction <add>, %30, %cst_21 [1] : vector<16x128xf32> to vector<16xf32>
      %32 = vector.shape_cast %31 : vector<16xf32> to vector<16x1xf32>
      %cst_22 = arith.constant 1.280000e+02 : f32
      %33 = vector.broadcast %cst_22 : f32 to vector<16x1xf32>
      %34 = arith.divf %32, %33 : vector<16x1xf32>
      %35 = vector.broadcast %34 : vector<16x1xf32> to vector<16x128xf32>
      %36 = arith.subf %30, %35 : vector<16x128xf32>
      %37 = arith.mulf %36, %36 : vector<16x128xf32>
      %cst_23 = arith.constant dense<0.000000e+00> : vector<16xf32>
      %38 = vector.multi_reduction <add>, %37, %cst_23 [1] : vector<16x128xf32> to vector<16xf32>
      %39 = vector.shape_cast %38 : vector<16xf32> to vector<16x1xf32>
      %cst_24 = arith.constant 1.280000e+02 : f32
      %40 = vector.broadcast %cst_24 : f32 to vector<16x1xf32>
      %41 = arith.divf %39, %40 : vector<16x1xf32>
      %cst_25 = arith.constant 9.99999997E-7 : f32
      %42 = vector.broadcast %cst_25 : f32 to vector<16x1xf32>
      %43 = arith.addf %41, %42 : vector<16x1xf32>
      %44 = math.rsqrt %43 : vector<16x1xf32>
      %45 = vector.broadcast %44 : vector<16x1xf32> to vector<16x128xf32>
      %46 = arith.mulf %36, %45 : vector<16x128xf32>
      %c0_26 = arith.constant 0 : index
      %c0_27 = arith.constant 0 : index
      %47 = vector.load %arg8[%c0_26, %c0_27] : memref<16x128xf32, #tpu.memory_space<vmem>>, vector<16x128xf32>
      tpu.vector_store %arg8[%c0_26, %c0_27], %46 {strides = array<i32>} : memref<16x128xf32, #tpu.memory_space<vmem>>, vector<16x128xf32>,
      %cst_28 = arith.constant 0.000000e+00 : f32
      %48 = vector.broadcast %cst_28 : f32 to vector<16x128xf32>
      %c0_29 = arith.constant 0 : index
      %c0_30 = arith.constant 0 : index
      %49 = vector.load %arg9[%c0_29, %c0_30] : memref<16x128xf32, #tpu.memory_space<vmem>>, vector<16x128xf32>
      tpu.vector_store %arg9[%c0_29, %c0_30], %48 {strides = array<i32>} : memref<16x128xf32, #tpu.memory_space<vmem>>, vector<16x128xf32>,
    } else {
    }
    %c0 = arith.constant 0 : index
    %c0_1 = arith.constant 0 : index
    %3 = vector.load %arg8[%c0, %c0_1] : memref<16x128xf32, #tpu.memory_space<vmem>>, vector<16x128xf32>
    %c0_2 = arith.constant 0 : index
    %c0_3 = arith.constant 0 : index
    %4 = vector.load %arg3[%c0_2, %c0_3] : memref<128x256xf32, #tpu.memory_space<vmem>>, vector<128x256xf32>
    %cst = arith.constant dense<0.000000e+00> : vector<16x256xf32>
    %5 = tpu.matmul %3, %4, %cst {dimension_numbers = #tpu.dot_dimension_numbers<[1], [0], [0], [1], [0, 0, 1, 1], [], []>} : vector<16x128xf32>, vector<128x256xf32>, vector<16x256xf32> -> vector<16x256xf32>
    %c0_4 = arith.constant 0 : index
    %c0_5 = arith.constant 0 : index
    %6 = vector.load %arg4[%c0_4, %c0_5] : memref<1x256xf32, #tpu.memory_space<vmem>>, vector<1x256xf32>
    %7 = vector.broadcast %6 : vector<1x256xf32> to vector<16x256xf32>
    %8 = arith.addf %5, %7 : vector<16x256xf32>
    %cst_6 = arith.constant 5.000000e-01 : f32
    %9 = vector.broadcast %cst_6 : f32 to vector<16x256xf32>
    %10 = arith.mulf %9, %8 : vector<16x256xf32>
    %11 = arith.mulf %8, %8 : vector<16x256xf32>
    %12 = arith.mulf %11, %8 : vector<16x256xf32>
    %cst_7 = arith.constant 4.471500e-02 : f32
    %13 = vector.broadcast %cst_7 : f32 to vector<16x256xf32>
    %14 = arith.mulf %13, %12 : vector<16x256xf32>
    %15 = arith.addf %8, %14 : vector<16x256xf32>
    %cst_8 = arith.constant 0.797884583 : f32
    %16 = vector.broadcast %cst_8 : f32 to vector<16x256xf32>
    %17 = arith.mulf %16, %15 : vector<16x256xf32>
    %18 = math.tanh %17 : vector<16x256xf32>
    %cst_9 = arith.constant 1.000000e+00 : f32
    %19 = vector.broadcast %cst_9 : f32 to vector<16x256xf32>
    %20 = arith.addf %19, %18 : vector<16x256xf32>
    %21 = arith.mulf %10, %20 : vector<16x256xf32>
    %c0_10 = arith.constant 0 : index
    %c0_11 = arith.constant 0 : index
    %22 = vector.load %arg9[%c0_10, %c0_11] : memref<16x128xf32, #tpu.memory_space<vmem>>, vector<16x128xf32>
    %c0_12 = arith.constant 0 : index
    %c0_13 = arith.constant 0 : index
    %23 = vector.load %arg5[%c0_12, %c0_13] : memref<256x128xf32, #tpu.memory_space<vmem>>, vector<256x128xf32>
    %cst_14 = arith.constant dense<0.000000e+00> : vector<16x128xf32>
    %24 = tpu.matmul %21, %23, %cst_14 {dimension_numbers = #tpu.dot_dimension_numbers<[1], [0], [0], [1], [0, 0, 1, 1], [], []>} : vector<16x256xf32>, vector<256x128xf32>, vector<16x128xf32> -> vector<16x128xf32>
    %25 = arith.addf %22, %24 : vector<16x128xf32>
    %c0_15 = arith.constant 0 : index
    %c0_16 = arith.constant 0 : index
    %26 = vector.load %arg9[%c0_15, %c0_16] : memref<16x128xf32, #tpu.memory_space<vmem>>, vector<16x128xf32>
    tpu.vector_store %arg9[%c0_15, %c0_16], %25 {strides = array<i32>} : memref<16x128xf32, #tpu.memory_space<vmem>>, vector<16x128xf32>,
    %c0_i32_17 = arith.constant 0 : i32
    %27 = arith.cmpi eq, %arg1, %c0_i32_17 : i32
    %28 = arith.extui %27 : i1 to i32
    %c0_i32_18 = arith.constant 0 : i32
    %29 = arith.cmpi ne, %28, %c0_i32_18 : i32
    scf.if %29 {
      %c0_19 = arith.constant 0 : index
      %c0_20 = arith.constant 0 : index
      %30 = vector.load %arg9[%c0_19, %c0_20] : memref<16x128xf32, #tpu.memory_space<vmem>>, vector<16x128xf32>
      %c0_21 = arith.constant 0 : index
      %c0_22 = arith.constant 0 : index
      %31 = vector.load %arg6[%c0_21, %c0_22] : memref<1x128xf32, #tpu.memory_space<vmem>>, vector<1x128xf32>
      %32 = vector.broadcast %31 : vector<1x128xf32> to vector<16x128xf32>
      %33 = arith.addf %30, %32 : vector<16x128xf32>
      %c0_23 = arith.constant 0 : index
      %c0_24 = arith.constant 0 : index
      %34 = vector.load %arg2[%c0_23, %c0_24] : memref<16x128xf32, #tpu.memory_space<vmem>>, vector<16x128xf32>
      %35 = arith.addf %33, %34 : vector<16x128xf32>
      %c0_25 = arith.constant 0 : index
      %c0_26 = arith.constant 0 : index
      %36 = vector.load %arg7[%c0_25, %c0_26] : memref<16x128xf32, #tpu.memory_space<vmem>>, vector<16x128xf32>
      tpu.vector_store %arg7[%c0_25, %c0_26], %35 {strides = array<i32>} : memref<16x128xf32, #tpu.memory_space<vmem>>, vector<16x128xf32>,
    } else {
    }
    return
  }
  func.func @transform_0(%arg0: i32, %arg1: i32) -> (i32, i32) {
    %c0_i32 = arith.constant 0 : i32
    %c0_i32_0 = arith.constant 0 : i32
    return %arg0, %c0_i32 : i32, i32
  }
  func.func @transform_1(%arg0: i32, %arg1: i32) -> (i32, i32) {
    %c0_i32 = arith.constant 0 : i32
    %c0_i32_0 = arith.constant 0 : i32
    return %c0_i32, %arg1 : i32, i32
  }
  func.func @transform_2(%arg0: i32, %arg1: i32) -> (i32, i32) {
    %c0_i32 = arith.constant 0 : i32
    %c0_i32_0 = arith.constant 0 : i32
    return %c0_i32, %arg1 : i32, i32
  }
  func.func @transform_3(%arg0: i32, %arg1: i32) -> (i32, i32) {
    %c0_i32 = arith.constant 0 : i32
    %c0_i32_0 = arith.constant 0 : i32
    return %arg1, %c0_i32 : i32, i32
  }
  func.func @transform_4(%arg0: i32, %arg1: i32) -> (i32, i32) {
    %c0_i32 = arith.constant 0 : i32
    %c0_i32_0 = arith.constant 0 : i32
    %c0_i32_1 = arith.constant 0 : i32
    return %c0_i32, %c0_i32_0 : i32, i32
  }
  func.func @transform_5(%arg0: i32, %arg1: i32) -> (i32, i32) {
    %c0_i32 = arith.constant 0 : i32
    %c0_i32_0 = arith.constant 0 : i32
    return %arg0, %c0_i32 : i32, i32
  }
}

</mosaic_0001>

<bundles_post_ra>
// kernel: pos_feed_forward.1
= control target key start
LH: loop header
LB: loop body
LE: loop exit
PB: predicated region body
PF: predicated region fallthrough
CT: control target
= control target key end

     0   :  { %s690_s0 = inlined_call_operand.vmem [shape: f32[16,128], index: 0, kind: input, shape index: {}]   ;;  %s691_s1 = inlined_call_operand.vmem [shape: f32[128,256], index: 1, kind: input, shape index: {}]   ;;  %s692_s2 = inlined_call_operand.vmem [shape: f32[1,256], index: 2, kind: input, shape index: {}]   ;;  %s693_s3 = inlined_call_operand.vmem [shape: f32[256,128], index: 3, kind: input, shape index: {}]   ;;  %s694_s4 = inlined_call_operand.vmem [shape: f32[1,128], index: 4, kind: input, shape index: {}]   ;;  %s695_s5 = inlined_call_operand.hbm [shape: f32[16,128], index: 5, kind: output, shape index: {}]  }
   0x1   :  { %v476_v0 = vld [vmem:[%s690_s0] sm:$0xff] }
   0x2   :  { %10 = vsyncpa [#allocation5], 0  ;;  %27 = vadd.xlane.f32.xlu0 %v476_v0  ;;  %v482_v1 = vld [vmem:[%s690_s0 + $0x8] sm:$0xff]  ;;  %v87_v2 = vld [vmem:[%s691_s1 + $0xf8] sm:$0xff]  ;;  %v439_v35 = vmov 0.0   ;;  %s440_s19 = smov [#allocation4]  }
   0x3   :  { %v86_v3 = vld [vmem:[%s691_s1 + $0xf0] sm:$0xff]  ;;  %v85_v4 = vld [vmem:[%s691_s1 + $0xe8] sm:$0xff]  ;;  %100 = vmatprep.subr.mxu0 %v87_v2  ;;  %v84_v5 = vld [vmem:[%s691_s1 + $0xe0] sm:$0xff]  ;;  %164 = vmatprep.mubr.f32.mxu0 %v439_v35  ;;  %s351_s20 = sshll.u32 %s440_s19, 4  ;;  %s352_s20 = int_to_ptr.vmem [resolvable:$true] %s351_s20 }
   0x4   :  { %101 = vmatpush1.msra.mxu0 %v86_v3  ;;  %v83_v6 = vld [vmem:[%s691_s1 + $0xd8] sm:$0xff]  ;;  %v82_v7 = vld [vmem:[%s691_s1 + $0xd0] sm:$0xff]  ;;  %v81_v8 = vld [vmem:[%s691_s1 + $0xc8] sm:$0xff]  ;;  %s417_s21 = scalar_lea.vmem %s352_s20, 256  ;;  %p422_p1 = scmp.lt.s32.totalorder %s352_s20, %s352_s20 }
   0x5   :  { %102 = vmatprep.subr.mxu0 %v85_v4  ;;  %v80_v9 = vld [vmem:[%s691_s1 + $0xc0] sm:$0xff]  ;;  %v79_v10 = vld [vmem:[%s691_s1 + $0xb8] sm:$0xff]  ;;  %v78_v11 = vld [vmem:[%s691_s1 + $0xb0] sm:$0xff]  ;;  %p418_p0 = scmp.ne.s32.totalorder %s352_s20, %s417_s21  ;;  %p423_p2 = scmp.lt.s32.totalorder %s417_s21, %s417_s21 }
   0x6   :  { %29 = vadd.xlane.f32.xlu0 %v482_v1  ;;  %103 = vmatpush1.msra.mxu0 %v84_v5  ;;  %v77_v12 = vld [vmem:[%s691_s1 + $0xa8] sm:$0xff]  ;;  %v76_v13 = vld [vmem:[%s691_s1 + $0xa0] sm:$0xff]  ;;  %v75_v22 = vld [vmem:[%s691_s1 + $0x98] sm:$0xff] }
   0x7   :  { %104 = vmatprep.subr.mxu0 %v83_v6  ;;  %v74_v23 = vld [vmem:[%s691_s1 + $0x90] sm:$0xff]  ;;  %v73_v24 = vld [vmem:[%s691_s1 + $0x88] sm:$0xff]  ;;  %v72_v25 = vld [vmem:[%s691_s1 + $0x80] sm:$0xff]  ;;  %p424_p3 = por %p423_p2, %p422_p1 }
   0x8   :  { %105 = vmatpush1.msra.mxu0 %v82_v7  ;;  %v71_v26 = vld [vmem:[%s691_s1 + $0x78] sm:$0xff]  ;;  %v70_v27 = vld [vmem:[%s691_s1 + $0x70] sm:$0xff]  ;;  %v69_v28 = vld [vmem:[%s691_s1 + $0x68] sm:$0xff] }
   0x9   :  { %106 = vmatprep.subr.mxu0 %v81_v8  ;;  %v68_v29 = vld [vmem:[%s691_s1 + $0x60] sm:$0xff]  ;;  %v67_v30 = vld [vmem:[%s691_s1 + $0x58] sm:$0xff]  ;;  %v66_v31 = vld [vmem:[%s691_s1 + $0x50] sm:$0xff]  ;;  %p425_p4 = pnand %p424_p3, %p418_p0 }
   0xa   :  { %107 = vmatpush1.msra.mxu0 %v80_v9  ;;  %v65_v32 = vld [vmem:[%s691_s1 + $0x48] sm:$0xff]  ;;  %v64_v33 = vld [vmem:[%s691_s1 + $0x40] sm:$0xff]  ;;  %v63_v34 = vld [vmem:[%s691_s1 + $0x38] sm:$0xff] }
   0xb   :  { %108 = vmatprep.subr.mxu0 %v79_v10  ;;  %v62_v36 = vld [vmem:[%s691_s1 + $0x30] sm:$0xff]  ;;  %v61_v37 = vld [vmem:[%s691_s1 + $0x28] sm:$0xff]  ;;  %v60_v38 = vld [vmem:[%s691_s1 + $0x20] sm:$0xff] }
   0xc   :  { %109 = vmatpush1.msra.mxu0 %v78_v11  ;;  %v59_v39 = vld [vmem:[%s691_s1 + $0x18] sm:$0xff]  ;;  %v58_v40 = vld [vmem:[%s691_s1 + $0x10] sm:$0xff]  ;;  %v57_v41 = vld [vmem:[%s691_s1 + $0x8] sm:$0xff] }
   0xd   :  { %110 = vmatprep.subr.mxu0 %v77_v12  ;;  %v56_v42 = vld [vmem:[%s691_s1] sm:$0xff]  ;;  %v246_v53 = vld [vmem:[%s693_s3 + $0xf8] sm:$0xff]  ;;  %v245_v55 = vld [vmem:[%s693_s3 + $0xf0] sm:$0xff] }
   0xe   :  { %111 = vmatpush1.msra.mxu0 %v76_v13  ;;  %363 = vmatprep.subr.mxu1 %v246_v53  ;;  %v230_v54 = vld [vmem:[%s693_s3 + $0x78] sm:$0xff]  ;;  %v229_v56 = vld [vmem:[%s693_s3 + $0x70] sm:$0xff]  ;;  %v244_v57 = vld [vmem:[%s693_s3 + $0xe8] sm:$0xff] }
   0xf   :  { %112 = vmatprep.subr.mxu0 %v75_v22  ;;  %364 = vmatpush3.msra.mxu1 %v230_v54  ;;  %v228_v58 = vld [vmem:[%s693_s3 + $0x68] sm:$0xff]  ;;  %v243_v59 = vld [vmem:[%s693_s3 + $0xe0] sm:$0xff]  ;;  %v242_v61 = vld [vmem:[%s693_s3 + $0xd8] sm:$0xff] }
  0x10   :  { %113 = vmatpush1.msra.mxu0 %v74_v23  ;;  %365 = vmatprep.subr.mxu1 %v245_v55  ;;  %v227_v60 = vld [vmem:[%s693_s3 + $0x60] sm:$0xff]  ;;  %v226_v62 = vld [vmem:[%s693_s3 + $0x58] sm:$0xff]  ;;  %v241_v63 = vld [vmem:[%s693_s3 + $0xd0] sm:$0xff]  ;;  %v90_v23 = vlaneseq }
  0x11   :  { %114 = vmatprep.subr.mxu0 %v73_v24  ;;  %366 = vmatpush3.msra.mxu1 %v229_v56  ;;  %v225_v2 = vld [vmem:[%s693_s3 + $0x50] sm:$0xff]  ;;  %v240_v3 = vld [vmem:[%s693_s3 + $0xc8] sm:$0xff]  ;;  %v239_v5 = vld [vmem:[%s693_s3 + $0xc0] sm:$0xff] }
  0x12   :  { %115 = vmatpush1.msra.mxu0 %v72_v25  ;;  %367 = vmatprep.subr.mxu1 %v244_v57  ;;  %v224_v4 = vld [vmem:[%s693_s3 + $0x48] sm:$0xff]  ;;  %v223_v6 = vld [vmem:[%s693_s3 + $0x40] sm:$0xff]  ;;  %v238_v7 = vld [vmem:[%s693_s3 + $0xb8] sm:$0xff]  ;;  %v91_v24 = vshrl.u32 %v90_v23, 7 }
  0x13   :  { %116 = vmatprep.subr.mxu0 %v71_v26  ;;  %368 = vmatpush3.msra.mxu1 %v228_v58  ;;  %v222_v8 = vld [vmem:[%s693_s3 + $0x38] sm:$0xff]  ;;  %v237_v9 = vld [vmem:[%s693_s3 + $0xb0] sm:$0xff]  ;;  %v236_v11 = vld [vmem:[%s693_s3 + $0xa8] sm:$0xff] }
  0x14   :  { %117 = vmatpush1.msra.mxu0 %v70_v27  ;;  %369 = vmatprep.subr.mxu1 %v243_v59  ;;  %v221_v10 = vld [vmem:[%s693_s3 + $0x30] sm:$0xff]  ;;  %v220_v12 = vld [vmem:[%s693_s3 + $0x28] sm:$0xff]  ;;  %v235_v13 = vld [vmem:[%s693_s3 + $0xa0] sm:$0xff]  ;;  %v92_v25 = vsub.s32 0, %v91_v24  ;;  %v96_v27 = vsub.s32 1, %v91_v24 }
  0x15   :  { %118 = vmatprep.subr.mxu0 %v69_v28  ;;  %370 = vmatpush3.msra.mxu1 %v227_v60  ;;  %v215_v22 = vld [vmem:[%s693_s3] sm:$0xff] }
  0x16   :  { %119 = vmatpush1.msra.mxu0 %v68_v29  ;;  %371 = vmatprep.subr.mxu1 %v242_v61  ;;  %v88_v26 = vld [vmem:[%s692_s2] sm:$0x3] }
  0x17   :  { %120 = vmatprep.subr.mxu0 %v67_v30  ;;  %372 = vmatpush3.msra.mxu1 %v226_v62  ;;  %v93_v28 = vrot.slane %v88_v26, %v92_v25  ;;  %v97_v29 = vrot.slane %v88_v26, %v96_v27 }
  0x18   :  { %121 = vmatpush1.msra.mxu0 %v66_v31  ;;  %373 = vmatprep.subr.mxu1 %v241_v63 }
  0x19   :  { %122 = vmatprep.subr.mxu0 %v65_v32  ;;  %374 = vmatpush3.msra.mxu1 %v225_v2 }
  0x1a   :  { %123 = vmatpush1.msra.mxu0 %v64_v33  ;;  %375 = vmatprep.subr.mxu1 %v240_v3 }
  0x1b   :  { %124 = vmatprep.subr.mxu0 %v63_v34  ;;  %376 = vmatpush3.msra.mxu1 %v224_v4 }
  0x1c   :  { %125 = vmatpush1.msra.mxu0 %v62_v36  ;;  %377 = vmatprep.subr.mxu1 %v239_v5 }
  0x1d   :  { %126 = vmatprep.subr.mxu0 %v61_v37  ;;  %378 = vmatpush3.msra.mxu1 %v223_v6 }
  0x1e   :  { %127 = vmatpush1.msra.mxu0 %v60_v38  ;;  %379 = vmatprep.subr.mxu1 %v238_v7 }
  0x1f   :  { %128 = vmatprep.subr.mxu0 %v59_v39  ;;  %380 = vmatpush3.msra.mxu1 %v222_v8 }
  0x20   :  { %129 = vmatpush1.msra.mxu0 %v58_v40  ;;  %381 = vmatprep.subr.mxu1 %v237_v9 }
  0x21   :  { %130 = vmatprep.subr.mxu0 %v57_v41  ;;  %382 = vmatpush3.msra.mxu1 %v221_v10 }
  0x22   :  { %131 = vmatpush1.msra.mxu0 %v56_v42  ;;  %383 = vmatprep.subr.mxu1 %v236_v11 }
  0x23   :  { %384 = vmatpush3.msra.mxu1 %v220_v12 }
  0x24   :  { %385 = vmatprep.subr.mxu1 %v235_v13 }
  0x8b   :  { %v28_v14 = vpop.xlane.xlu0 %27 }
  0x8c   :  { %v32_v15 = vmul.f32 0.0078125, %v28_v14  ;;  %v219_v14 = vld [vmem:[%s693_s3 + $0x20] sm:$0xff] }
  0x8d   :  { %386 = vmatpush3.msra.mxu1 %v219_v14  ;;  %v362_v14 = vld [vmem:[%s694_s4] ss:$0 sm:$0xff] }
  0x8e   :  { %v34_v16 = vsub.f32 %v476_v0, %v32_v15  ;;  %v234_v15 = vld [vmem:[%s693_s3 + $0x98] sm:$0xff] }
  0x8f   :  { %v30_v17 = vpop.xlane.xlu0 %29  ;;  %387 = vmatprep.subr.mxu1 %v234_v15 }
  0x90   :  { %v33_v18 = vmul.f32 0.0078125, %v30_v17  ;;  %v36_v19 = vmul.f32 %v34_v16, %v34_v16  ;;  %v233_v17 = vld [vmem:[%s693_s3 + $0x90] sm:$0xff] }
  0x92   :  { %v35_v20 = vsub.f32 %v482_v1, %v33_v18  ;;  %38 = vadd.xlane.f32.xlu1 %v36_v19  ;;  %v217_v18 = vld [vmem:[%s693_s3 + $0x10] sm:$0xff]  ;;  %v232_v19 = vld [vmem:[%s693_s3 + $0x88] sm:$0xff] }
  0x94   :  { %v37_v21 = vmul.f32 %v35_v20, %v35_v20 }
  0x96   :  { %40 = vadd.xlane.f32.xlu1 %v37_v21  ;;  %v231_v21 = vld [vmem:[%s693_s3 + $0x80] sm:$0xff] }
 0x11b   :  { %v39_v43 = vpop.xlane.xlu1 %38 }
 0x11c   :  { %v42_v44 = vmul.f32 0.0078125, %v39_v43 }
 0x11e   :  { %v44_v45 = vadd.f32 1e-06, %v42_v44 }
 0x11f   :  { %v41_v46 = vpop.xlane.xlu1 %40 }
 0x120   :  { %405 = vrsqrt.f32 %v44_v45  ;;  %v43_v47 = vmul.f32 0.0078125, %v41_v46 }
 0x122   :  { %v45_v48 = vadd.f32 1e-06, %v43_v47 }
 0x124   :  { %407 = vrsqrt.f32 %v45_v48 }
 0x12d   :  { %v406_v49 = vpop.eup %405 }
 0x12e   :  { %v48_v50 = vmul.f32 %v406_v49, %v34_v16  ;;  %v218_v16 = vld [vmem:[%s693_s3 + $0x18] sm:$0xff] }
 0x12f   :  { %388 = vmatpush3.msra.mxu1 %v218_v16 }
 0x130   :  { %165 = vmatmul.mubr.f32.vlgmr.msra.gmra.mxu0 %v48_v50  ;;  %389 = vmatprep.subr.mxu1 %v233_v17 }
 0x131   :  { %v408_v51 = vpop.eup %407  ;;  %170 = vmatprep.mubr.f32.mxu0 %v439_v35  ;;  %390 = vmatpush3.msra.mxu1 %v217_v18 }
 0x132   :  { %v49_v52 = vmul.f32 %v408_v51, %v35_v20  ;;  %v216_v20 = vld [vmem:[%s693_s3 + $0x8] sm:$0xff]  ;;  %391 = vmatprep.subr.mxu1 %v232_v19 }
 0x133   :  { %392 = vmatpush3.msra.mxu1 %v216_v20 }
 0x134   :  { %171 = vmatmul.mubr.f32.gmra.mxu0 %v49_v52  ;;  %393 = vmatprep.subr.mxu1 %v231_v21 }
 0x135   :  { %394 = vmatpush3.msra.mxu1 %v215_v22 }
 0x1f0   :  { %v166_v30 = vpop.f32.mrf.mxu0 }
 0x1f1   :  { %v167_v31 = vadd.f32 %v166_v30, %v93_v28 }
 0x1f2   :  { %v168_v32 = vpop.f32.mrf.mxu0 }
 0x1f3   :  { %v181_v33 = vmul.f32 %v167_v31, %v167_v31  ;;  %v169_v34 = vadd.f32 %v168_v32, %v97_v29  ;;  %v177_v2 = vmul.f32 0.5, %v167_v31 }
 0x1f4   :  { %v172_v35 = vpop.f32.mrf.mxu0 }
 0x1f5   :  { %v185_v36 = vmul.f32 %v181_v33, %v167_v31  ;;  %v182_v37 = vmul.f32 %v169_v34, %v169_v34  ;;  %v173_v38 = vadd.f32 %v172_v35, %v93_v28  ;;  %v178_v61 = vmul.f32 0.5, %v169_v34 }
 0x1f6   :  { %v174_v39 = vpop.f32.mrf.mxu0 }
 0x1f7   :  { %v189_v40 = vmul.f32 0.044715, %v185_v36  ;;  %v186_v41 = vmul.f32 %v182_v37, %v169_v34  ;;  %v183_v42 = vmul.f32 %v173_v38, %v173_v38  ;;  %v175_v43 = vadd.f32 %v174_v39, %v97_v29 }
 0x1f8   :  { %v179_v9 = vmul.f32 0.5, %v173_v38 }
 0x1f9   :  { %v193_v44 = vadd.f32 %v189_v40, %v167_v31  ;;  %v187_v45 = vmul.f32 %v183_v42, %v173_v38  ;;  %v184_v46 = vmul.f32 %v175_v43, %v175_v43  ;;  %v190_v47 = vmul.f32 0.044715, %v186_v41 }
 0x1fa   :  { %v180_v7 = vmul.f32 0.5, %v175_v43 }
 0x1fb   :  { %v197_v48 = vmul.f32 0.7978846, %v193_v44  ;;  %v191_v49 = vmul.f32 0.044715, %v187_v45  ;;  %v188_v50 = vmul.f32 %v184_v46, %v175_v43  ;;  %v194_v51 = vadd.f32 %v190_v47, %v169_v34 }
 0x1fd   :  { %v195_v52 = vadd.f32 %v191_v49, %v173_v38  ;;  %v192_v53 = vmul.f32 0.044715, %v188_v50  ;;  %v198_v54 = vmul.f32 0.7978846, %v194_v51  ;;  %409 = vtanh.f32 %v197_v48 }
 0x1ff   :  { %v199_v55 = vmul.f32 0.7978846, %v195_v52  ;;  %v196_v56 = vadd.f32 %v192_v53, %v175_v43  ;;  %411 = vtanh.f32 %v198_v54 }
 0x201   :  { %v200_v57 = vmul.f32 0.7978846, %v196_v56  ;;  %413 = vtanh.f32 %v199_v55 }
 0x203   :  { %415 = vtanh.f32 %v200_v57 }
 0x20a   :  { %v410_v58 = vpop.eup %409 }
 0x20b   :  { %v205_v60 = vadd.f32 1.0, %v410_v58 }
 0x20c   :  { %v412_v59 = vpop.eup %411 }
 0x20d   :  { %v206_v62 = vadd.f32 1.0, %v412_v59  ;;  %v209_v5 = vmul.f32 %v205_v60, %v177_v2 }
 0x20e   :  { %v414_v63 = vpop.eup %413 }
 0x20f   :  { %v210_v3 = vmul.f32 %v206_v62, %v178_v61  ;;  %v207_v6 = vadd.f32 1.0, %v414_v63 }
 0x210   :  { %v416_v4 = vpop.eup %415 }
 0x211   :  { %311 = vmatprep.mubr.f32.mxu1 %v210_v3  ;;  %v208_v8 = vadd.f32 1.0, %v416_v4  ;;  %v211_v11 = vmul.f32 %v207_v6, %v179_v9 }
 0x212   :  { %312 = vmatmul.mubr.f32.vlgmr.msra.gmra.mxu1 %v209_v5 }
 0x213   :  { %v212_v10 = vmul.f32 %v208_v8, %v180_v7 }
 0x215   :  { %316 = vmatprep.mubr.f32.mxu1 %v212_v10 }
 0x216   :  { %317 = vmatmul.mubr.f32.gmra.mxu1 %v211_v11 }
 0x2d2   :  { %v395_v12 = vpop.f32.mrf.mxu1 }
 0x2d4   :  { %v396_v13 = vpop.f32.mrf.mxu1 }
 0x2d5   :  { %v397_v15 = vadd.f32 %v396_v13, %v395_v12 }
 0x2d6   :  { %v398_v16 = vpop.f32.mrf.mxu1 }
 0x2d7   :  { %v338_v17 = vadd.f32 %v397_v15, %v362_v14 }
 0x2d8   :  { %v399_v18 = vpop.f32.mrf.mxu1 }
 0x2d9   :  { %v342_v19 = vadd.f32 %v338_v17, %v476_v0  ;;  %v400_v20 = vadd.f32 %v399_v18, %v398_v16 }
 0x2db   :  { %344 = vst [vmem:[#allocation4] sm:$0xff] %v342_v19  ;;  %v339_v21 = vadd.f32 %v400_v20, %v362_v14 }
 0x2dd   :  { %v343_v22 = vadd.f32 %v339_v21, %v482_v1 }
 0x2df   :  { %345 = vst [vmem:[#allocation4 + $0x8] sm:$0xff] %v343_v22 }
 0x2e0   :  { %428 = shalt.err (!%p425_p4)
}
 0x2e1   :  { %s441_s4 = smov 128   ;;  %s442_s22 = smov 8  }
 0x2e2   :  { %357 = dma.vmem_to_hbm [thread:$0]  %s352_s20, 256, %s695_s5, [#allocation5], %s441_s4, %s441_s4, %s442_s22  }
 0x2e3   :  { %437 = dma.done.wait [#allocation5], 256  }
 0x2e4   :  { %438 = vsyncadd [#allocation5], 4294967040 }
 0x2e5   :  { %361 = vsyncpa [#allocation5], 1 }

</bundles_post_ra>
